<compile_context>
chip_gen: v6e
topology: v6e:2x2x1
jax: 0.10.0
libtpu: 0.0.40
codegen_flags: <defaults>
</compile_context>

<pallas_src>
import jax
import jax.numpy as jnp
from jax.experimental import pallas as pl

# ----------------------------- config (small, synthetic) ---------------------
BATCH = 2
SEQ = 8
HIDDEN = 32
NUM_HEADS = 4
NUM_KV_HEADS = 2
HEAD_DIM = HIDDEN // NUM_HEADS                      # 8
KV_GROUPS = NUM_HEADS // NUM_KV_HEADS               # 2
SCALING = HEAD_DIM ** (-0.5)
ROPE_THETA = 10000.0

NHHD = NUM_HEADS * HEAD_DIM                         # 32
NKVHD = NUM_KV_HEADS * HEAD_DIM                     # 16
WFUSED = 2 * NHHD + 3 * NKVHD                       # 112: [q | k | v | rot(q) | rot(k)]

# MXU operand dtype: bf16 is the native fast path on v6e/v7x (f32 matmul is
# emulated on v7x).  Accumulation stays f32 via preferred_element_type and all
# elementwise RoPE / mask / softmax math stays f32, so only the operand casts
# change.  Tolerances in __main__ are loosened accordingly.
MATMUL_DTYPE = jnp.bfloat16


# ----------------------------- Pallas kernel ---------------------------------
def _mllama_self_attn_kernel(
    hs_ref, mask_ref, cosq_ref, sinq_ref, cosk_ref, sink_ref,
    wfused_ref, wo_ref, out_ref, attnw_ref,
):
    # ---- single fused projection: q(scaled) | k | v | rot(q)(scaled) | rot(k)
    fused = jnp.dot(hs_ref[...], wfused_ref[...],
                    preferred_element_type=jnp.float32)        # (B*S, WFUSED) f32

    o = 0
    q = fused[:, o:o + NHHD]; o += NHHD
    k = fused[:, o:o + NKVHD]; o += NKVHD
    v = fused[:, o:o + NKVHD]; o += NKVHD
    q_rot = fused[:, o:o + NHHD]; o += NHHD
    k_rot = fused[:, o:o + NKVHD]

    # ---- RoPE combine (f32 elementwise; SCALING already folded into q cols) ----
    q = q * cosq_ref[...] + q_rot * sinq_ref[...]
    k = k * cosk_ref[...] + k_rot * sink_ref[...]

    qm = q.astype(MATMUL_DTYPE)
    km = k.astype(MATMUL_DTYPE)
    vm = v.astype(MATMUL_DTYPE)

    w_rows = []     # per batch: (S, NH*S)
    ctx_rows = []   # per batch: (S, NHHD)
    for b in range(BATCH):
        r0 = b * SEQ
        mask_b = mask_ref[b]                                        # (S, S) f32
        mask_g = jnp.concatenate([mask_b] * KV_GROUPS, axis=0)      # (G*S, S)

        w_heads = [None] * NUM_HEADS
        ctx_heads = [None] * NUM_HEADS
        for j in range(NUM_KV_HEADS):
            h0 = j * KV_GROUPS
            # Stack this KV group's query heads along the sublane axis.
            q_grp = jnp.concatenate(
                [qm[r0:r0 + SEQ, (h0 + g) * HEAD_DIM:(h0 + g + 1) * HEAD_DIM]
                 for g in range(KV_GROUPS)], axis=0)                # (G*S, HD)
            k_j = km[r0:r0 + SEQ, j * HEAD_DIM:(j + 1) * HEAD_DIM]  # (S, HD)
            v_j = vm[r0:r0 + SEQ, j * HEAD_DIM:(j + 1) * HEAD_DIM]  # (S, HD)

            s = jnp.einsum("qd,kd->qk", q_grp, k_j,
                           preferred_element_type=jnp.float32)      # (G*S, S) f32
            s = s + mask_g

            # softmax in float32 (matches torch softmax(dtype=float32))
            m = jnp.max(s, axis=-1, keepdims=True)
            e = jnp.exp(s - m)
            denom = jnp.sum(e, axis=-1, keepdims=True)
            w = e * pl.reciprocal(denom, approx=True)               # divide -> EUP

            ctx = jnp.dot(w.astype(MATMUL_DTYPE), v_j,
                          preferred_element_type=jnp.float32)       # (G*S, HD)

            for g in range(KV_GROUPS):
                w_heads[h0 + g] = w[g * SEQ:(g + 1) * SEQ, :]
                ctx_heads[h0 + g] = ctx[g * SEQ:(g + 1) * SEQ, :]

        w_rows.append(jnp.concatenate(w_heads, axis=1))             # (S, NH*S)
        ctx_rows.append(jnp.concatenate(ctx_heads, axis=1))         # (S, NHHD)

    # ---- single full-width stores; output projection on the register slab ----
    attnw_ref[...] = jnp.concatenate(w_rows, axis=0)                # (B*S, NH*S)
    ctx_full = jnp.concatenate(ctx_rows, axis=0)                    # (B*S, NHHD)
    out_ref[...] = jnp.dot(ctx_full.astype(MATMUL_DTYPE), wo_ref[...],
                           preferred_element_type=jnp.float32)


# ----------------------------- one-time parameter prep ------------------------
def prepare_params(wq, wk, wv, wo, cos, sin, batch):
    """One-time preprocessing (hoisted out of the per-call path):
    - transpose torch nn.Linear weights to (in_features, out_features)
    - fold SCALING into the q weight columns
    - fuse q/k/v + block-diagonal rotate_half rotations into one weight matrix
    - tile cos/sin (S, HEAD_DIM) per head and per batch to the fused widths
    """
    half = HEAD_DIM // 2
    rot = jnp.zeros((HEAD_DIM, HEAD_DIM), jnp.float32)
    # rotate_half(x) == x @ rot  (per head)
    rot = rot.at[jnp.arange(half) + half, jnp.arange(half)].set(-1.0)
    rot = rot.at[jnp.arange(half), jnp.arange(half) + half].set(1.0)
    rot_q = jnp.kron(jnp.eye(NUM_HEADS, dtype=jnp.float32), rot)
    rot_k = jnp.kron(jnp.eye(NUM_KV_HEADS, dtype=jnp.float32), rot)

    wq_t = (wq.T * SCALING).astype(jnp.float32)   # (H, NHHD), scale pre-folded
    wk_t = wk.T.astype(jnp.float32)               # (H, NKVHD)
    wv_t = wv.T.astype(jnp.float32)               # (H, NKVHD)
    w_fused = jnp.concatenate(
        [wq_t, wk_t, wv_t, wq_t @ rot_q, wk_t @ rot_k], axis=1)    # (H, WFUSED)

    return dict(
        w_fused=w_fused.astype(MATMUL_DTYPE),
        wo_t=wo.T.astype(MATMUL_DTYPE),
        cos_q=jnp.tile(cos, (batch, NUM_HEADS)).astype(jnp.float32),     # (B*S, NHHD)
        sin_q=jnp.tile(sin, (batch, NUM_HEADS)).astype(jnp.float32),
        cos_k=jnp.tile(cos, (batch, NUM_KV_HEADS)).astype(jnp.float32),  # (B*S, NKVHD)
        sin_k=jnp.tile(sin, (batch, NUM_KV_HEADS)).astype(jnp.float32),
    )


# ----------------------------- wrapper ----------------------------------------
def mllama_text_self_attention(hidden_states, attention_mask, params):
    # TODO(synk): past_key_value cache update and training-time dropout are not
    # implemented (eval-mode forward only, matching dropout=0.0 / no cache).
    B, S, H = hidden_states.shape
    BS = B * S

    # Batch folded into the block: one kernel invocation over a (B*S, H) slab.
    hs2d = hidden_states.reshape(BS, H).astype(MATMUL_DTYPE)
    mask3 = attention_mask.reshape(B, S, S).astype(jnp.float32)

    out_shapes = (
        jax.ShapeDtypeStruct((BS, H), jnp.float32),
        jax.ShapeDtypeStruct((BS, NUM_HEADS * S), jnp.float32),
    )

    in_specs = [
        pl.BlockSpec((BS, H), lambda i: (0, 0)),                 # hidden_states
        pl.BlockSpec((B, S, S), lambda i: (0, 0, 0)),            # attention_mask
        pl.BlockSpec((BS, NHHD), lambda i: (0, 0)),              # cos_q
        pl.BlockSpec((BS, NHHD), lambda i: (0, 0)),              # sin_q
        pl.BlockSpec((BS, NKVHD), lambda i: (0, 0)),             # cos_k
        pl.BlockSpec((BS, NKVHD), lambda i: (0, 0)),             # sin_k
        pl.BlockSpec((H, WFUSED), lambda i: (0, 0)),             # fused weights
        pl.BlockSpec((NHHD, H), lambda i: (0, 0)),               # wo^T
    ]
    out_specs = (
        pl.BlockSpec((BS, H), lambda i: (0, 0)),
        pl.BlockSpec((BS, NUM_HEADS * S), lambda i: (0, 0)),
    )

    out2d, attnw_wide = pl.pallas_call(
        _mllama_self_attn_kernel,
        out_shape=out_shapes,
        grid=(1,),
        in_specs=in_specs,
        out_specs=out_specs,
    )(hs2d, mask3,
      params["cos_q"], params["sin_q"], params["cos_k"], params["sin_k"],
      params["w_fused"], params["wo_t"])

    # Layout plumbing outside the kernel.
    attn_out = out2d.reshape(B, S, H)
    attn_w = attnw_wide.reshape(B, S, NUM_HEADS, S).transpose(0, 2, 1, 3)
    return attn_out, attn_w


# ----------------------------- pure-JAX reference ------------------------------
def _rotate_half(x):
    x1 = x[..., : x.shape[-1] // 2]
    x2 = x[..., x.shape[-1] // 2:]
    return jnp.concatenate((-x2, x1), axis=-1)


def _reference(hidden_states, cos, sin, attention_mask, wq, wk, wv, wo):
    B, S, H = hidden_states.shape
    q = hidden_states @ wq.T
    k = hidden_states @ wk.T
    v = hidden_states @ wv.T
    q = q.reshape(B, S, NUM_HEADS, HEAD_DIM).transpose(0, 2, 1, 3)
    k = k.reshape(B, S, NUM_KV_HEADS, HEAD_DIM).transpose(0, 2, 1, 3)
    v = v.reshape(B, S, NUM_KV_HEADS, HEAD_DIM).transpose(0, 2, 1, 3)
    c = cos[:, None, :, :]
    s = sin[:, None, :, :]
    q = q * c + _rotate_half(q) * s
    k = k * c + _rotate_half(k) * s
    k = jnp.repeat(k, KV_GROUPS, axis=1)
    v = jnp.repeat(v, KV_GROUPS, axis=1)
    scores = jnp.einsum("bhqd,bhkd->bhqk", q, k) * SCALING + attention_mask
    w = jax.nn.softmax(scores.astype(jnp.float32), axis=-1)
    ctx = jnp.einsum("bhqk,bhkd->bhqd", w, v)
    ctx = ctx.transpose(0, 2, 1, 3).reshape(B, S, NUM_HEADS * HEAD_DIM)
    out = ctx @ wo.T
    return out, w


# ----------------------------- main -------------------------------------------
if __name__ == "__main__":
    key = jax.random.PRNGKey(0)
    k_hs, k_q, k_k, k_v, k_o = jax.random.split(key, 5)

    hidden_states = jax.random.normal(k_hs, (BATCH, SEQ, HIDDEN), jnp.float32)

    # torch nn.Linear weight layout: (out_features, in_features), no bias.
    wq = 0.02 * jax.random.normal(k_q, (NUM_HEADS * HEAD_DIM, HIDDEN), jnp.float32)
    wk = 0.02 * jax.random.normal(k_k, (NUM_KV_HEADS * HEAD_DIM, HIDDEN), jnp.float32)
    wv = 0.02 * jax.random.normal(k_v, (NUM_KV_HEADS * HEAD_DIM, HIDDEN), jnp.float32)
    wo = 0.02 * jax.random.normal(k_o, (HIDDEN, NUM_HEADS * HEAD_DIM), jnp.float32)

    # Rotary embeddings (llama-style), shared across the batch: (S, HEAD_DIM).
    inv_freq = 1.0 / (ROPE_THETA ** (jnp.arange(0, HEAD_DIM, 2, dtype=jnp.float32) / HEAD_DIM))
    pos = jnp.arange(SEQ, dtype=jnp.float32)
    freqs = pos[:, None] * inv_freq[None, :]
    emb = jnp.concatenate([freqs, freqs], axis=-1)               # (S, HEAD_DIM)
    cos = jnp.cos(emb)
    sin = jnp.sin(emb)
    cos_b = jnp.broadcast_to(cos[None], (BATCH, SEQ, HEAD_DIM))  # for reference
    sin_b = jnp.broadcast_to(sin[None], (BATCH, SEQ, HEAD_DIM))

    # Additive causal mask (B, 1, S, S).
    causal = jnp.tril(jnp.ones((SEQ, SEQ), bool))
    attention_mask = jnp.where(causal, 0.0, -1e9).astype(jnp.float32)
    attention_mask = jnp.broadcast_to(attention_mask[None, None], (BATCH, 1, SEQ, SEQ))

    params = prepare_params(wq, wk, wv, wo, cos, sin, BATCH)    # one-time prep

    attn_out, attn_w = mllama_text_self_attention(hidden_states, attention_mask, params)
    jax.block_until_ready((attn_out, attn_w))

    ref_out, ref_w = _reference(
        hidden_states, cos_b, sin_b, attention_mask, wq, wk, wv, wo)

    assert attn_out.shape == (BATCH, SEQ, HIDDEN)
    assert attn_w.shape == (BATCH, NUM_HEADS, SEQ, SEQ)
    # Tolerances account for bf16 MXU operands (f32 accumulate) and the
    # approximate EUP reciprocal in the softmax normalization.
    assert jnp.allclose(attn_out, ref_out, rtol=2e-2, atol=2e-3)
    assert jnp.allclose(attn_w, ref_w, rtol=2e-2, atol=2e-3)

    print("KERNEL_OK")
</pallas_src>

<mosaic_0001>
module attributes {stable_mosaic.version = 11 : i64} {
  func.func @_mllama_self_attn_kernel(%arg0: i32, %arg1: memref<16x32xbf16, #tpu.memory_space<vmem>>, %arg2: memref<2x8x8xf32, #tpu.memory_space<vmem>>, %arg3: memref<16x32xf32, #tpu.memory_space<vmem>>, %arg4: memref<16x32xf32, #tpu.memory_space<vmem>>, %arg5: memref<16x16xf32, #tpu.memory_space<vmem>>, %arg6: memref<16x16xf32, #tpu.memory_space<vmem>>, %arg7: memref<32x112xbf16, #tpu.memory_space<vmem>>, %arg8: memref<32x32xbf16, #tpu.memory_space<vmem>>, %arg9: memref<16x32xf32, #tpu.memory_space<vmem>>, %arg10: memref<16x32xf32, #tpu.memory_space<vmem>>) attributes {dimension_semantics = [#tpu.dimension_semantics<arbitrary>], iteration_bounds = array<i64: 1>, scalar_prefetch = 0 : i64, scratch_operands = 0 : i64, tpu.core_type = #tpu.core_type<tc>, window_params = [{pipeline_mode = #tpu.pipeline_mode<synchronous>, transform_indices = @transform_0, window_bounds = array<i64: 16, 32>}, {pipeline_mode = #tpu.pipeline_mode<synchronous>, transform_indices = @transform_1, window_bounds = array<i64: 2, 8, 8>}, {pipeline_mode = #tpu.pipeline_mode<synchronous>, transform_indices = @transform_2, window_bounds = array<i64: 16, 32>}, {pipeline_mode = #tpu.pipeline_mode<synchronous>, transform_indices = @transform_3, window_bounds = array<i64: 16, 32>}, {pipeline_mode = #tpu.pipeline_mode<synchronous>, transform_indices = @transform_4, window_bounds = array<i64: 16, 16>}, {pipeline_mode = #tpu.pipeline_mode<synchronous>, transform_indices = @transform_5, window_bounds = array<i64: 16, 16>}, {pipeline_mode = #tpu.pipeline_mode<synchronous>, transform_indices = @transform_6, window_bounds = array<i64: 32, 112>}, {pipeline_mode = #tpu.pipeline_mode<synchronous>, transform_indices = @transform_7, window_bounds = array<i64: 32, 32>}, {pipeline_mode = #tpu.pipeline_mode<synchronous>, transform_indices = @transform_8, window_bounds = array<i64: 16, 32>}, {pipeline_mode = #tpu.pipeline_mode<synchronous>, transform_indices = @transform_9, window_bounds = array<i64: 16, 32>}]} {
    %c0 = arith.constant 0 : index
    %c0_0 = arith.constant 0 : index
    %0 = vector.load %arg1[%c0, %c0_0] : memref<16x32xbf16, #tpu.memory_space<vmem>>, vector<16x32xbf16>
    %c0_1 = arith.constant 0 : index
    %c0_2 = arith.constant 0 : index
    %1 = vector.load %arg7[%c0_1, %c0_2] : memref<32x112xbf16, #tpu.memory_space<vmem>>, vector<32x112xbf16>
    %cst = arith.constant dense<0.000000e+00> : vector<16x112xf32>
    %2 = tpu.matmul %0, %1, %cst {dimension_numbers = #tpu.dot_dimension_numbers<[1], [0], [0], [1], [0, 0, 1, 1], [], []>} : vector<16x32xbf16>, vector<32x112xbf16>, vector<16x112xf32> -> vector<16x112xf32>
    %3 = vector.extract_strided_slice %2 {offsets = [0, 0], sizes = [16, 32], strides = [1, 1]} : vector<16x112xf32> to vector<16x32xf32>
    %4 = vector.extract_strided_slice %2 {offsets = [0, 32], sizes = [16, 16], strides = [1, 1]} : vector<16x112xf32> to vector<16x16xf32>
    %5 = vector.extract_strided_slice %2 {offsets = [0, 48], sizes = [16, 16], strides = [1, 1]} : vector<16x112xf32> to vector<16x16xf32>
    %6 = vector.extract_strided_slice %2 {offsets = [0, 64], sizes = [16, 32], strides = [1, 1]} : vector<16x112xf32> to vector<16x32xf32>
    %7 = vector.extract_strided_slice %2 {offsets = [0, 96], sizes = [16, 16], strides = [1, 1]} : vector<16x112xf32> to vector<16x16xf32>
    %c0_3 = arith.constant 0 : index
    %c0_4 = arith.constant 0 : index
    %8 = vector.load %arg3[%c0_3, %c0_4] : memref<16x32xf32, #tpu.memory_space<vmem>>, vector<16x32xf32>
    %9 = arith.mulf %3, %8 : vector<16x32xf32>
    %c0_5 = arith.constant 0 : index
    %c0_6 = arith.constant 0 : index
    %10 = vector.load %arg4[%c0_5, %c0_6] : memref<16x32xf32, #tpu.memory_space<vmem>>, vector<16x32xf32>
    %11 = arith.mulf %6, %10 : vector<16x32xf32>
    %12 = arith.addf %9, %11 : vector<16x32xf32>
    %c0_7 = arith.constant 0 : index
    %c0_8 = arith.constant 0 : index
    %13 = vector.load %arg5[%c0_7, %c0_8] : memref<16x16xf32, #tpu.memory_space<vmem>>, vector<16x16xf32>
    %14 = arith.mulf %4, %13 : vector<16x16xf32>
    %c0_9 = arith.constant 0 : index
    %c0_10 = arith.constant 0 : index
    %15 = vector.load %arg6[%c0_9, %c0_10] : memref<16x16xf32, #tpu.memory_space<vmem>>, vector<16x16xf32>
    %16 = arith.mulf %7, %15 : vector<16x16xf32>
    %17 = arith.addf %14, %16 : vector<16x16xf32>
    %18 = arith.truncf %12 : vector<16x32xf32> to vector<16x32xbf16>
    %19 = arith.truncf %17 : vector<16x16xf32> to vector<16x16xbf16>
    %20 = arith.truncf %5 : vector<16x16xf32> to vector<16x16xbf16>
    %c0_11 = arith.constant 0 : index
    %c0_12 = arith.constant 0 : index
    %c0_13 = arith.constant 0 : index
    %21 = vector.load %arg2[%c0_11, %c0_12, %c0_13] : memref<2x8x8xf32, #tpu.memory_space<vmem>>, vector<1x8x8xf32>
    %22 = vector.shape_cast %21 : vector<1x8x8xf32> to vector<8x8xf32>
    %23 = tpu.concatenate %22, %22 in 0 : vector<8x8xf32>, vector<8x8xf32> -> vector<16x8xf32>
    %24 = vector.extract_strided_slice %18 {offsets = [0, 0], sizes = [8, 8], strides = [1, 1]} : vector<16x32xbf16> to vector<8x8xbf16>
    %25 = vector.extract_strided_slice %18 {offsets = [0, 8], sizes = [8, 8], strides = [1, 1]} : vector<16x32xbf16> to vector<8x8xbf16>
    %26 = tpu.concatenate %24, %25 in 0 : vector<8x8xbf16>, vector<8x8xbf16> -> vector<16x8xbf16>
    %27 = vector.extract_strided_slice %19 {offsets = [0, 0], sizes = [8, 8], strides = [1, 1]} : vector<16x16xbf16> to vector<8x8xbf16>
    %28 = vector.extract_strided_slice %20 {offsets = [0, 0], sizes = [8, 8], strides = [1, 1]} : vector<16x16xbf16> to vector<8x8xbf16>
    "tpu.trace_start"() <{level = 10 : i32, message = "qd,kd->qk"}> : () -> ()
    %cst_14 = arith.constant dense<0.000000e+00> : vector<16x8xf32>
    %29 = tpu.matmul %26, %27, %cst_14 {dimension_numbers = #tpu.dot_dimension_numbers<[1], [1], [0], [0], [0, 0, 1, 0], [], []>} : vector<16x8xbf16>, vector<8x8xbf16>, vector<16x8xf32> -> vector<16x8xf32>
    "tpu.trace_stop"() : () -> ()
    %30 = arith.addf %29, %23 : vector<16x8xf32>
    %cst_15 = arith.constant dense<0xFF800000> : vector<16xf32>
    %31 = vector.multi_reduction <maximumf>, %30, %cst_15 [1] : vector<16x8xf32> to vector<16xf32>
    %32 = vector.shape_cast %31 : vector<16xf32> to vector<16x1xf32>
    %33 = vector.broadcast %32 : vector<16x1xf32> to vector<16x8xf32>
    %34 = arith.subf %30, %33 : vector<16x8xf32>
    %35 = math.exp %34 : vector<16x8xf32>
    %cst_16 = arith.constant dense<0.000000e+00> : vector<16xf32>
    %36 = vector.multi_reduction <add>, %35, %cst_16 [1] : vector<16x8xf32> to vector<16xf32>
    %37 = vector.shape_cast %36 : vector<16xf32> to vector<16x1xf32>
    %38 = tpu.reciprocal %37 {approx = true} : vector<16x1xf32> -> vector<16x1xf32>
    %39 = vector.broadcast %38 : vector<16x1xf32> to vector<16x8xf32>
    %40 = arith.mulf %35, %39 : vector<16x8xf32>
    %41 = arith.truncf %40 : vector<16x8xf32> to vector<16x8xbf16>
    %cst_17 = arith.constant dense<0.000000e+00> : vector<16x8xf32>
    %42 = tpu.matmul %41, %28, %cst_17 {dimension_numbers = #tpu.dot_dimension_numbers<[1], [0], [0], [1], [0, 0, 1, 1], [], []>} : vector<16x8xbf16>, vector<8x8xbf16>, vector<16x8xf32> -> vector<16x8xf32>
    %43 = vector.extract_strided_slice %40 {offsets = [0, 0], sizes = [8, 8], strides = [1, 1]} : vector<16x8xf32> to vector<8x8xf32>
    %44 = vector.extract_strided_slice %42 {offsets = [0, 0], sizes = [8, 8], strides = [1, 1]} : vector<16x8xf32> to vector<8x8xf32>
    %45 = vector.extract_strided_slice %40 {offsets = [8, 0], sizes = [8, 8], strides = [1, 1]} : vector<16x8xf32> to vector<8x8xf32>
    %46 = vector.extract_strided_slice %42 {offsets = [8, 0], sizes = [8, 8], strides = [1, 1]} : vector<16x8xf32> to vector<8x8xf32>
    %47 = vector.extract_strided_slice %18 {offsets = [0, 16], sizes = [8, 8], strides = [1, 1]} : vector<16x32xbf16> to vector<8x8xbf16>
    %48 = vector.extract_strided_slice %18 {offsets = [0, 24], sizes = [8, 8], strides = [1, 1]} : vector<16x32xbf16> to vector<8x8xbf16>
    %49 = tpu.concatenate %47, %48 in 0 : vector<8x8xbf16>, vector<8x8xbf16> -> vector<16x8xbf16>
    %50 = vector.extract_strided_slice %19 {offsets = [0, 8], sizes = [8, 8], strides = [1, 1]} : vector<16x16xbf16> to vector<8x8xbf16>
    %51 = vector.extract_strided_slice %20 {offsets = [0, 8], sizes = [8, 8], strides = [1, 1]} : vector<16x16xbf16> to vector<8x8xbf16>
    "tpu.trace_start"() <{level = 10 : i32, message = "qd,kd->qk"}> : () -> ()
    %cst_18 = arith.constant dense<0.000000e+00> : vector<16x8xf32>
    %52 = tpu.matmul %49, %50, %cst_18 {dimension_numbers = #tpu.dot_dimension_numbers<[1], [1], [0], [0], [0, 0, 1, 0], [], []>} : vector<16x8xbf16>, vector<8x8xbf16>, vector<16x8xf32> -> vector<16x8xf32>
    "tpu.trace_stop"() : () -> ()
    %53 = arith.addf %52, %23 : vector<16x8xf32>
    %cst_19 = arith.constant dense<0xFF800000> : vector<16xf32>
    %54 = vector.multi_reduction <maximumf>, %53, %cst_19 [1] : vector<16x8xf32> to vector<16xf32>
    %55 = vector.shape_cast %54 : vector<16xf32> to vector<16x1xf32>
    %56 = vector.broadcast %55 : vector<16x1xf32> to vector<16x8xf32>
    %57 = arith.subf %53, %56 : vector<16x8xf32>
    %58 = math.exp %57 : vector<16x8xf32>
    %cst_20 = arith.constant dense<0.000000e+00> : vector<16xf32>
    %59 = vector.multi_reduction <add>, %58, %cst_20 [1] : vector<16x8xf32> to vector<16xf32>
    %60 = vector.shape_cast %59 : vector<16xf32> to vector<16x1xf32>
    %61 = tpu.reciprocal %60 {approx = true} : vector<16x1xf32> -> vector<16x1xf32>
    %62 = vector.broadcast %61 : vector<16x1xf32> to vector<16x8xf32>
    %63 = arith.mulf %58, %62 : vector<16x8xf32>
    %64 = arith.truncf %63 : vector<16x8xf32> to vector<16x8xbf16>
    %cst_21 = arith.constant dense<0.000000e+00> : vector<16x8xf32>
    %65 = tpu.matmul %64, %51, %cst_21 {dimension_numbers = #tpu.dot_dimension_numbers<[1], [0], [0], [1], [0, 0, 1, 1], [], []>} : vector<16x8xbf16>, vector<8x8xbf16>, vector<16x8xf32> -> vector<16x8xf32>
    %66 = vector.extract_strided_slice %63 {offsets = [0, 0], sizes = [8, 8], strides = [1, 1]} : vector<16x8xf32> to vector<8x8xf32>
    %67 = vector.extract_strided_slice %65 {offsets = [0, 0], sizes = [8, 8], strides = [1, 1]} : vector<16x8xf32> to vector<8x8xf32>
    %68 = vector.extract_strided_slice %63 {offsets = [8, 0], sizes = [8, 8], strides = [1, 1]} : vector<16x8xf32> to vector<8x8xf32>
    %69 = vector.extract_strided_slice %65 {offsets = [8, 0], sizes = [8, 8], strides = [1, 1]} : vector<16x8xf32> to vector<8x8xf32>
    %70 = tpu.concatenate %43, %45, %66, %68 in 1 : vector<8x8xf32>, vector<8x8xf32>, vector<8x8xf32>, vector<8x8xf32> -> vector<8x32xf32>
    %71 = tpu.concatenate %44, %46, %67, %69 in 1 : vector<8x8xf32>, vector<8x8xf32>, vector<8x8xf32>, vector<8x8xf32> -> vector<8x32xf32>
    %c1 = arith.constant 1 : index
    %c0_22 = arith.constant 0 : index
    %c0_23 = arith.constant 0 : index
    %72 = vector.load %arg2[%c1, %c0_22, %c0_23] : memref<2x8x8xf32, #tpu.memory_space<vmem>>, vector<1x8x8xf32>
    %73 = vector.shape_cast %72 : vector<1x8x8xf32> to vector<8x8xf32>
    %74 = tpu.concatenate %73, %73 in 0 : vector<8x8xf32>, vector<8x8xf32> -> vector<16x8xf32>
    %75 = vector.extract_strided_slice %18 {offsets = [8, 0], sizes = [8, 8], strides = [1, 1]} : vector<16x32xbf16> to vector<8x8xbf16>
    %76 = vector.extract_strided_slice %18 {offsets = [8, 8], sizes = [8, 8], strides = [1, 1]} : vector<16x32xbf16> to vector<8x8xbf16>
    %77 = tpu.concatenate %75, %76 in 0 : vector<8x8xbf16>, vector<8x8xbf16> -> vector<16x8xbf16>
    %78 = vector.extract_strided_slice %19 {offsets = [8, 0], sizes = [8, 8], strides = [1, 1]} : vector<16x16xbf16> to vector<8x8xbf16>
    %79 = vector.extract_strided_slice %20 {offsets = [8, 0], sizes = [8, 8], strides = [1, 1]} : vector<16x16xbf16> to vector<8x8xbf16>
    "tpu.trace_start"() <{level = 10 : i32, message = "qd,kd->qk"}> : () -> ()
    %cst_24 = arith.constant dense<0.000000e+00> : vector<16x8xf32>
    %80 = tpu.matmul %77, %78, %cst_24 {dimension_numbers = #tpu.dot_dimension_numbers<[1], [1], [0], [0], [0, 0, 1, 0], [], []>} : vector<16x8xbf16>, vector<8x8xbf16>, vector<16x8xf32> -> vector<16x8xf32>
    "tpu.trace_stop"() : () -> ()
    %81 = arith.addf %80, %74 : vector<16x8xf32>
    %cst_25 = arith.constant dense<0xFF800000> : vector<16xf32>
    %82 = vector.multi_reduction <maximumf>, %81, %cst_25 [1] : vector<16x8xf32> to vector<16xf32>
    %83 = vector.shape_cast %82 : vector<16xf32> to vector<16x1xf32>
    %84 = vector.broadcast %83 : vector<16x1xf32> to vector<16x8xf32>
    %85 = arith.subf %81, %84 : vector<16x8xf32>
    %86 = math.exp %85 : vector<16x8xf32>
    %cst_26 = arith.constant dense<0.000000e+00> : vector<16xf32>
    %87 = vector.multi_reduction <add>, %86, %cst_26 [1] : vector<16x8xf32> to vector<16xf32>
    %88 = vector.shape_cast %87 : vector<16xf32> to vector<16x1xf32>
    %89 = tpu.reciprocal %88 {approx = true} : vector<16x1xf32> -> vector<16x1xf32>
    %90 = vector.broadcast %89 : vector<16x1xf32> to vector<16x8xf32>
    %91 = arith.mulf %86, %90 : vector<16x8xf32>
    %92 = arith.truncf %91 : vector<16x8xf32> to vector<16x8xbf16>
    %cst_27 = arith.constant dense<0.000000e+00> : vector<16x8xf32>
    %93 = tpu.matmul %92, %79, %cst_27 {dimension_numbers = #tpu.dot_dimension_numbers<[1], [0], [0], [1], [0, 0, 1, 1], [], []>} : vector<16x8xbf16>, vector<8x8xbf16>, vector<16x8xf32> -> vector<16x8xf32>
    %94 = vector.extract_strided_slice %91 {offsets = [0, 0], sizes = [8, 8], strides = [1, 1]} : vector<16x8xf32> to vector<8x8xf32>
    %95 = vector.extract_strided_slice %93 {offsets = [0, 0], sizes = [8, 8], strides = [1, 1]} : vector<16x8xf32> to vector<8x8xf32>
    %96 = vector.extract_strided_slice %91 {offsets = [8, 0], sizes = [8, 8], strides = [1, 1]} : vector<16x8xf32> to vector<8x8xf32>
    %97 = vector.extract_strided_slice %93 {offsets = [8, 0], sizes = [8, 8], strides = [1, 1]} : vector<16x8xf32> to vector<8x8xf32>
    %98 = vector.extract_strided_slice %18 {offsets = [8, 16], sizes = [8, 8], strides = [1, 1]} : vector<16x32xbf16> to vector<8x8xbf16>
    %99 = vector.extract_strided_slice %18 {offsets = [8, 24], sizes = [8, 8], strides = [1, 1]} : vector<16x32xbf16> to vector<8x8xbf16>
    %100 = tpu.concatenate %98, %99 in 0 : vector<8x8xbf16>, vector<8x8xbf16> -> vector<16x8xbf16>
    %101 = vector.extract_strided_slice %19 {offsets = [8, 8], sizes = [8, 8], strides = [1, 1]} : vector<16x16xbf16> to vector<8x8xbf16>
    %102 = vector.extract_strided_slice %20 {offsets = [8, 8], sizes = [8, 8], strides = [1, 1]} : vector<16x16xbf16> to vector<8x8xbf16>
    "tpu.trace_start"() <{level = 10 : i32, message = "qd,kd->qk"}> : () -> ()
    %cst_28 = arith.constant dense<0.000000e+00> : vector<16x8xf32>
    %103 = tpu.matmul %100, %101, %cst_28 {dimension_numbers = #tpu.dot_dimension_numbers<[1], [1], [0], [0], [0, 0, 1, 0], [], []>} : vector<16x8xbf16>, vector<8x8xbf16>, vector<16x8xf32> -> vector<16x8xf32>
    "tpu.trace_stop"() : () -> ()
    %104 = arith.addf %103, %74 : vector<16x8xf32>
    %cst_29 = arith.constant dense<0xFF800000> : vector<16xf32>
    %105 = vector.multi_reduction <maximumf>, %104, %cst_29 [1] : vector<16x8xf32> to vector<16xf32>
    %106 = vector.shape_cast %105 : vector<16xf32> to vector<16x1xf32>
    %107 = vector.broadcast %106 : vector<16x1xf32> to vector<16x8xf32>
    %108 = arith.subf %104, %107 : vector<16x8xf32>
    %109 = math.exp %108 : vector<16x8xf32>
    %cst_30 = arith.constant dense<0.000000e+00> : vector<16xf32>
    %110 = vector.multi_reduction <add>, %109, %cst_30 [1] : vector<16x8xf32> to vector<16xf32>
    %111 = vector.shape_cast %110 : vector<16xf32> to vector<16x1xf32>
    %112 = tpu.reciprocal %111 {approx = true} : vector<16x1xf32> -> vector<16x1xf32>
    %113 = vector.broadcast %112 : vector<16x1xf32> to vector<16x8xf32>
    %114 = arith.mulf %109, %113 : vector<16x8xf32>
    %115 = arith.truncf %114 : vector<16x8xf32> to vector<16x8xbf16>
    %cst_31 = arith.constant dense<0.000000e+00> : vector<16x8xf32>
    %116 = tpu.matmul %115, %102, %cst_31 {dimension_numbers = #tpu.dot_dimension_numbers<[1], [0], [0], [1], [0, 0, 1, 1], [], []>} : vector<16x8xbf16>, vector<8x8xbf16>, vector<16x8xf32> -> vector<16x8xf32>
    %117 = vector.extract_strided_slice %114 {offsets = [0, 0], sizes = [8, 8], strides = [1, 1]} : vector<16x8xf32> to vector<8x8xf32>
    %118 = vector.extract_strided_slice %116 {offsets = [0, 0], sizes = [8, 8], strides = [1, 1]} : vector<16x8xf32> to vector<8x8xf32>
    %119 = vector.extract_strided_slice %114 {offsets = [8, 0], sizes = [8, 8], strides = [1, 1]} : vector<16x8xf32> to vector<8x8xf32>
    %120 = vector.extract_strided_slice %116 {offsets = [8, 0], sizes = [8, 8], strides = [1, 1]} : vector<16x8xf32> to vector<8x8xf32>
    %121 = tpu.concatenate %94, %96, %117, %119 in 1 : vector<8x8xf32>, vector<8x8xf32>, vector<8x8xf32>, vector<8x8xf32> -> vector<8x32xf32>
    %122 = tpu.concatenate %95, %97, %118, %120 in 1 : vector<8x8xf32>, vector<8x8xf32>, vector<8x8xf32>, vector<8x8xf32> -> vector<8x32xf32>
    %123 = tpu.concatenate %70, %121 in 0 : vector<8x32xf32>, vector<8x32xf32> -> vector<16x32xf32>
    %c0_32 = arith.constant 0 : index
    %c0_33 = arith.constant 0 : index
    %124 = vector.load %arg10[%c0_32, %c0_33] : memref<16x32xf32, #tpu.memory_space<vmem>>, vector<16x32xf32>
    tpu.vector_store %arg10[%c0_32, %c0_33], %123 {strides = array<i32>} : memref<16x32xf32, #tpu.memory_space<vmem>>, vector<16x32xf32>,
    %125 = tpu.concatenate %71, %122 in 0 : vector<8x32xf32>, vector<8x32xf32> -> vector<16x32xf32>
    %126 = arith.truncf %125 : vector<16x32xf32> to vector<16x32xbf16>
    %c0_34 = arith.constant 0 : index
    %c0_35 = arith.constant 0 : index
    %127 = vector.load %arg8[%c0_34, %c0_35] : memref<32x32xbf16, #tpu.memory_space<vmem>>, vector<32x32xbf16>
    %cst_36 = arith.constant dense<0.000000e+00> : vector<16x32xf32>
    %128 = tpu.matmul %126, %127, %cst_36 {dimension_numbers = #tpu.dot_dimension_numbers<[1], [0], [0], [1], [0, 0, 1, 1], [], []>} : vector<16x32xbf16>, vector<32x32xbf16>, vector<16x32xf32> -> vector<16x32xf32>
    %c0_37 = arith.constant 0 : index
    %c0_38 = arith.constant 0 : index
    %129 = vector.load %arg9[%c0_37, %c0_38] : memref<16x32xf32, #tpu.memory_space<vmem>>, vector<16x32xf32>
    tpu.vector_store %arg9[%c0_37, %c0_38], %128 {strides = array<i32>} : memref<16x32xf32, #tpu.memory_space<vmem>>, vector<16x32xf32>,
    return
  }
  func.func @transform_0(%arg0: i32) -> (i32, i32) {
    %c0_i32 = arith.constant 0 : i32
    %c0_i32_0 = arith.constant 0 : i32
    %c0_i32_1 = arith.constant 0 : i32
    return %c0_i32, %c0_i32_0 : i32, i32
  }
  func.func @transform_1(%arg0: i32) -> (i32, i32, i32) {
    %c0_i32 = arith.constant 0 : i32
    %c0_i32_0 = arith.constant 0 : i32
    %c0_i32_1 = arith.constant 0 : i32
    %c0_i32_2 = arith.constant 0 : i32
    return %c0_i32, %c0_i32_0, %c0_i32_1 : i32, i32, i32
  }
  func.func @transform_2(%arg0: i32) -> (i32, i32) {
    %c0_i32 = arith.constant 0 : i32
    %c0_i32_0 = arith.constant 0 : i32
    %c0_i32_1 = arith.constant 0 : i32
    return %c0_i32, %c0_i32_0 : i32, i32
  }
  func.func @transform_3(%arg0: i32) -> (i32, i32) {
    %c0_i32 = arith.constant 0 : i32
    %c0_i32_0 = arith.constant 0 : i32
    %c0_i32_1 = arith.constant 0 : i32
    return %c0_i32, %c0_i32_0 : i32, i32
  }
  func.func @transform_4(%arg0: i32) -> (i32, i32) {
    %c0_i32 = arith.constant 0 : i32
    %c0_i32_0 = arith.constant 0 : i32
    %c0_i32_1 = arith.constant 0 : i32
    return %c0_i32, %c0_i32_0 : i32, i32
  }
  func.func @transform_5(%arg0: i32) -> (i32, i32) {
    %c0_i32 = arith.constant 0 : i32
    %c0_i32_0 = arith.constant 0 : i32
    %c0_i32_1 = arith.constant 0 : i32
    return %c0_i32, %c0_i32_0 : i32, i32
  }
  func.func @transform_6(%arg0: i32) -> (i32, i32) {
    %c0_i32 = arith.constant 0 : i32
    %c0_i32_0 = arith.constant 0 : i32
    %c0_i32_1 = arith.constant 0 : i32
    return %c0_i32, %c0_i32_0 : i32, i32
  }
  func.func @transform_7(%arg0: i32) -> (i32, i32) {
    %c0_i32 = arith.constant 0 : i32
    %c0_i32_0 = arith.constant 0 : i32
    %c0_i32_1 = arith.constant 0 : i32
    return %c0_i32, %c0_i32_0 : i32, i32
  }
  func.func @transform_8(%arg0: i32) -> (i32, i32) {
    %c0_i32 = arith.constant 0 : i32
    %c0_i32_0 = arith.constant 0 : i32
    %c0_i32_1 = arith.constant 0 : i32
    return %c0_i32, %c0_i32_0 : i32, i32
  }
  func.func @transform_9(%arg0: i32) -> (i32, i32) {
    %c0_i32 = arith.constant 0 : i32
    %c0_i32_0 = arith.constant 0 : i32
    %c0_i32_1 = arith.constant 0 : i32
    return %c0_i32, %c0_i32_0 : i32, i32
  }
}

</mosaic_0001>

<bundles_post_ra>
// kernel: tpu_custom_call.1
= control target key start
LH: loop header
LB: loop body
LE: loop exit
PB: predicated region body
PF: predicated region fallthrough
CT: control target
= control target key end

     0   :  { %15 = vsyncpa [#allocation3], 0  ;;  %s1608_s0 = inlined_call_operand.hbm [shape: bf16[16,32], index: 0, kind: input, shape index: {}]   ;;  %s1609_s1 = inlined_call_operand.hbm [shape: f32[2,8,8], index: 1, kind: input, shape index: {}]   ;;  %s1610_s2 = inlined_call_operand.hbm [shape: f32[16,32], index: 2, kind: input, shape index: {}]   ;;  %s1611_s3 = inlined_call_operand.hbm [shape: f32[16,32], index: 3, kind: input, shape index: {}]   ;;  %s1612_s4 = inlined_call_operand.hbm [shape: f32[16,16], index: 4, kind: input, shape index: {}]   ;;  %s1613_s5 = inlined_call_operand.hbm [shape: f32[16,16], index: 5, kind: input, shape index: {}]   ;;  %s1614_s6 = inlined_call_operand.hbm [shape: bf16[32,112], index: 6, kind: input, shape index: {}]   ;;  %s1615_s7 = inlined_call_operand.hbm [shape: bf16[32,32], index: 7, kind: input, shape index: {}]   ;;  %s1616_s8 = inlined_call_operand.hbm [shape: f32[16,32], index: 8, kind: output, shape index: {0}]   ;;  %s1617_s9 = inlined_call_operand.hbm [shape: f32[16,32], index: 9, kind: output, shape index: {1}]  }
   0x1   :  { %16 = vsyncpa [#allocation6], 0 }
   0x2   :  { %17 = vsyncpa [#allocation9], 0 }
   0x3   :  { %18 = vsyncpa [#allocation12], 0 }
   0x4   :  { %19 = vsyncpa [#allocation15], 0 }
   0x5   :  { %20 = vsyncpa [#allocation4], 0 }
   0x6   :  { %21 = vsyncpa [#allocation18], 0  ;;  %s1339_s30 = smov [#allocation5]  }
   0x7   :  { %s39_s10 = sshll.u32 %s1339_s30, 4  ;;  %s40_s10 = int_to_ptr.vmem [resolvable:$true] %s39_s10 }
   0x8   :  { %s1133_s11 = scalar_lea.vmem %s40_s10, 256  ;;  %p1138_p1 = scmp.lt.s32.totalorder %s40_s10, %s40_s10 }
   0x9   :  { %p1134_p0 = scmp.ne.s32.totalorder %s40_s10, %s1133_s11  ;;  %p1139_p2 = scmp.lt.s32.totalorder %s1133_s11, %s1133_s11 }
   0xb   :  { %p1140_p3 = por %p1139_p2, %p1138_p1 }
   0xd   :  { %p1141_p4 = pnand %p1140_p3, %p1134_p0 }
   0xf   :  { %1144 = shalt.err (!%p1141_p4)
}
  0x10   :  { %s1340_s12 = smov 128   ;;  %s1341_s13 = smov 8  }
  0x11   :  { %45 = dma.hbm_to_vmem [thread:$0]  %s1609_s1, 256, %s40_s10, [#allocation6], %s1340_s12, %s1340_s12, %s1341_s13  }
  0x12   :  { %s1342_s16 = smov [#allocation8]   ;;  %s1343_s18 = smov [#allocation11]  }
  0x13   :  { %s63_s17 = sshll.u32 %s1342_s16, 4  ;;  %s87_s19 = sshll.u32 %s1343_s18, 4  ;;  %s64_s17 = int_to_ptr.vmem [resolvable:$true] %s63_s17  ;;  %s88_s19 = int_to_ptr.vmem [resolvable:$true] %s87_s19 }
  0x14   :  { %s1153_s20 = scalar_lea.vmem %s64_s17, 256  ;;  %p1158_p6 = scmp.lt.s32.totalorder %s64_s17, %s64_s17 }
  0x15   :  { %p1154_p5 = scmp.ne.s32.totalorder %s64_s17, %s1153_s20  ;;  %p1159_p7 = scmp.lt.s32.totalorder %s1153_s20, %s1153_s20 }
  0x17   :  { %p1160_p8 = por %p1159_p7, %p1158_p6 }
  0x19   :  { %p1161_p9 = pnand %p1160_p8, %p1154_p5 }
  0x1b   :  { %1164 = shalt.err (!%p1161_p9)
}
  0x1c   :  { %69 = dma.hbm_to_vmem [thread:$0]  %s1611_s3, 256, %s64_s17, [#allocation9], %s1340_s12, %s1340_s12, %s1341_s13  }
  0x1d   :  { %s1173_s1 = scalar_lea.vmem %s88_s19, 256  ;;  %p1178_p11 = scmp.lt.s32.totalorder %s88_s19, %s88_s19 }
  0x1e   :  { %p1174_p10 = scmp.ne.s32.totalorder %s88_s19, %s1173_s1  ;;  %p1179_p12 = scmp.lt.s32.totalorder %s1173_s1, %s1173_s1 }
  0x20   :  { %p1180_p13 = por %p1179_p12, %p1178_p11 }
  0x22   :  { %p1181_p0 = pnand %p1180_p13, %p1174_p10 }
  0x24   :  { %1184 = shalt.err (!%p1181_p0)
}
  0x25   :  { %93 = dma.hbm_to_vmem [thread:$0]  %s1613_s5, 256, %s88_s19, [#allocation12], %s1340_s12, %s1340_s12, %s1341_s13  }
  0x26   :  { %s1344_s25 = smov [#allocation2]  }
  0x27   :  { %s27_s26 = sshll.u32 %s1344_s25, 4  ;;  %s28_s26 = int_to_ptr.vmem [resolvable:$true] %s27_s26 }
  0x28   :  { %s1193_s27 = scalar_lea.vmem %s28_s26, 128  ;;  %p1198_p2 = scmp.lt.s32.totalorder %s28_s26, %s28_s26 }
  0x29   :  { %p1194_p1 = scmp.ne.s32.totalorder %s28_s26, %s1193_s27  ;;  %p1199_p3 = scmp.lt.s32.totalorder %s1193_s27, %s1193_s27 }
  0x2b   :  { %p1200_p4 = por %p1199_p3, %p1198_p2 }
  0x2d   :  { %p1201_p5 = pnand %p1200_p4, %p1194_p1 }
  0x2f   :  { %1204 = shalt.err (!%p1201_p5)
}
  0x30   :  { %s1345_s3 = smov 64   ;;  %s1346_s28 = smov 4  }
  0x31   :  { %33 = dma.hbm_to_vmem [thread:$0]  %s1608_s0, 128, %s28_s26, [#allocation3], %s1345_s3, %s1345_s3, %s1346_s28  }
  0x32   :  { %s1347_s5 = smov [#allocation7]   ;;  %s1348_s11 = smov [#allocation10]  }
  0x33   :  { %s51_s10 = sshll.u32 %s1347_s5, 4  ;;  %s75_s14 = sshll.u32 %s1348_s11, 4  ;;  %s52_s10 = int_to_ptr.vmem [resolvable:$true] %s51_s10  ;;  %s76_s14 = int_to_ptr.vmem [resolvable:$true] %s75_s14 }
  0x34   :  { %s1213_s15 = scalar_lea.vmem %s52_s10, 256  ;;  %p1218_p7 = scmp.lt.s32.totalorder %s52_s10, %s52_s10 }
  0x35   :  { %p1214_p6 = scmp.ne.s32.totalorder %s52_s10, %s1213_s15  ;;  %p1219_p8 = scmp.lt.s32.totalorder %s1213_s15, %s1213_s15 }
  0x37   :  { %p1220_p9 = por %p1219_p8, %p1218_p7 }
  0x39   :  { %p1221_p10 = pnand %p1220_p9, %p1214_p6 }
  0x3b   :  { %1224 = shalt.err (!%p1221_p10)
}
  0x3c   :  { %57 = dma.hbm_to_vmem [thread:$0]  %s1610_s2, 256, %s52_s10, [#allocation6], %s1340_s12, %s1340_s12, %s1341_s13  }
  0x3d   :  { %s1233_s0 = scalar_lea.vmem %s76_s14, 256  ;;  %p1238_p12 = scmp.lt.s32.totalorder %s76_s14, %s76_s14 }
  0x3e   :  { %p1234_p11 = scmp.ne.s32.totalorder %s76_s14, %s1233_s0  ;;  %p1239_p13 = scmp.lt.s32.totalorder %s1233_s0, %s1233_s0 }
  0x40   :  { %p1240_p0 = por %p1239_p13, %p1238_p12 }
  0x42   :  { %p1241_p1 = pnand %p1240_p0, %p1234_p11 }
  0x44   :  { %1244 = shalt.err (!%p1241_p1)
}
  0x45   :  { %81 = dma.hbm_to_vmem [thread:$0]  %s1612_s4, 256, %s76_s14, [#allocation9], %s1340_s12, %s1340_s12, %s1341_s13  }
  0x46   :  { %s1349_s20 = smov [#allocation13]   ;;  %s1350_s22 = smov [#allocation14]  }
  0x47   :  { %s99_s21 = sshll.u32 %s1349_s20, 4  ;;  %s111_s1 = sshll.u32 %s1350_s22, 4  ;;  %s100_s21 = int_to_ptr.vmem [resolvable:$true] %s99_s21  ;;  %s112_s1 = int_to_ptr.vmem [resolvable:$true] %s111_s1 }
  0x48   :  { %s1253_s2 = scalar_lea.vmem %s100_s21, 256  ;;  %p1258_p3 = scmp.lt.s32.totalorder %s100_s21, %s100_s21 }
  0x49   :  { %p1254_p2 = scmp.ne.s32.totalorder %s100_s21, %s1253_s2  ;;  %p1259_p4 = scmp.lt.s32.totalorder %s1253_s2, %s1253_s2 }
  0x4b   :  { %p1260_p5 = por %p1259_p4, %p1258_p3 }
  0x4d   :  { %p1261_p6 = pnand %p1260_p5, %p1254_p2 }
  0x4f   :  { %1264 = shalt.err (!%p1261_p6)
}
  0x50   :  { %105 = dma.hbm_to_vmem [thread:$0]  %s1614_s6, 256, %s100_s21, [#allocation12], %s1345_s3, %s1345_s3, %s1346_s28  }
  0x51   :  { %s1273_s4 = scalar_lea.vmem %s112_s1, 256  ;;  %p1278_p8 = scmp.lt.s32.totalorder %s112_s1, %s112_s1 }
  0x52   :  { %p1274_p7 = scmp.ne.s32.totalorder %s112_s1, %s1273_s4  ;;  %p1279_p9 = scmp.lt.s32.totalorder %s1273_s4, %s1273_s4 }
  0x54   :  { %p1280_p10 = por %p1279_p9, %p1278_p8 }
  0x56   :  { %p1281_p11 = pnand %p1280_p10, %p1274_p7 }
  0x58   :  { %1284 = shalt.err (!%p1281_p11)
}
  0x59   :  { %117 = dma.hbm_to_vmem [thread:$0]  %s1615_s7, 256, %s112_s1, [#allocation15], %s1345_s3, %s1345_s3, %s1346_s28  }
  0x5a   :  { %1325 = dma.done.wait [#allocation3], 128  }
  0x5b   :  { %1326 = vsyncadd [#allocation3], 4294967168 }
  0x5c   :  { %1327 = dma.done.wait [#allocation6], 512  }
  0x5d   :  { %1328 = vsyncadd [#allocation6], 4294966784 }
  0x5e   :  { %1329 = dma.done.wait [#allocation9], 512  }
  0x5f   :  { %1330 = vsyncadd [#allocation9], 4294966784 }
  0x60   :  { %1331 = dma.done.wait [#allocation12], 512  }
  0x61   :  { %1332 = vsyncadd [#allocation12], 4294966784 }
  0x62   :  { %1333 = dma.done.wait [#allocation15], 256  }
  0x63   :  { %1334 = vsyncadd [#allocation15], 4294967040  ;;  %v1351_v0 = vmov 0.0   ;;  %vm1352_vm0 = vmmov 0   ;;  %v1088_v1 = vld [vmem:[#allocation13 + $0x8] sm:$0xff]   ;;  %v1089_v2 = vld [vmem:[#allocation13] sm:$0xff]  }
  0x64   :  { %984 = vmatprep.subr.bf16.mxu0 %v1351_v0  ;;  %988 = vmatprep.mubr.msk.bf16.mxu0 %vm1352_vm0, %v1351_v0  ;;  %v1090_v3 = vld [vmem:[#allocation2] sm:$0xff]   ;;  %v249_v4 = vld [vmem:[#allocation11] sm:$0xff]  ;;  %s1353_s6 = smov 96   ;;  %v250_v6 = vld [vmem:[#allocation11 + $0x8] sm:$0xff]  ;;  %vm166_vm1 = vcmask 261120   ;;  %s1354_s7 = smov 32  }
  0x65   :  { %992 = vmatprep.subr.bf16.mxu1 %v1351_v0  ;;  %994 = vmatprep.mubr.msk.bf16.mxu1 %vm1352_vm0, %v1351_v0  ;;  %v215_v5 = vld [vmem:[#allocation8] sm:$0xff]  ;;  %v216_v7 = vld [vmem:[#allocation8 + $0x8] sm:$0xff]  ;;  %v237_v15 = vld [vmem:[#allocation10] sm:$0xff]  ;;  %s1355_s27 = smov 120   ;;  %vm279_vm2 = vcmask 1043456   ;;  %s1357_s28 = smov 112  }
  0x66   :  { %985 = vmatpush3.bf16.msra.mxu0 %v1088_v1  ;;  %253 = vrot.lane.b32.xlu1 %v249_v4, %s1353_s6  ;;  %v238_v18 = vld [vmem:[#allocation10 + $0x8] sm:$0xff]  ;;  %v211_v22 = vld [vmem:[#allocation7] sm:$0xff]  ;;  %vm286_vm3 = vcmask 64512   ;;  %v274_v56 = vld [vmem:[#allocation5] sm:$0xff]  ;;  %s1358_s29 = smov 80   ;;  %s1359_s30 = smov 72  }
  0x67   :  { %986 = vmatprep.subr.bf16.mxu0 %v1351_v0  ;;  %219 = vrot.lane.b32.xlu0 %v215_v5, %s1345_s3  ;;  %v212_v24 = vld [vmem:[#allocation7 + $0x8] sm:$0xff]  ;;  %s1360_s5 = smov 16   ;;  %s1361_s10 = smov 24   ;;  %vm543_vm4 = vcmask 130048   ;;  %vm545_vm5 = vcmask 195584  }
  0x68   :  { %s1362_s11 = smov [#allocation17]  }
  0x69   :  { %s927_s14 = sshll.u32 %s1362_s11, 4  ;;  %s928_s14 = int_to_ptr.vmem [resolvable:$true] %s927_s14 }
  0x6a   :  { %987 = vmatpush3.bf16.msra.mxu0 %v1089_v2  ;;  %255 = vrot.lane.b32.xlu1 %v250_v6, %s1353_s6  ;;  %s1285_s15 = scalar_lea.vmem %s928_s14, 256  ;;  %p1290_p13 = scmp.lt.s32.totalorder %s928_s14, %s928_s14 }
  0x6b   :  { %998 = vmatprep.subr.bf16.mxu0 %v1351_v0  ;;  %221 = vrot.lane.b32.xlu0 %v216_v7, %s1345_s3  ;;  %p1286_p12 = scmp.ne.s32.totalorder %s928_s14, %s1285_s15  ;;  %p1291_p0 = scmp.lt.s32.totalorder %s1285_s15, %s1285_s15 }
  0x6d   :  { %989 = vmatmul.mubr.msk.bf16.vlgmr.msra.gmra.mxu0 %vm166_vm1, %v1090_v3  ;;  %p1292_p1 = por %p1291_p0, %p1290_p13 }
  0x6e   :  { %1000 = vmatprep.mubr.msk.bf16.mxu0 %vm1352_vm0, %v1351_v0 }
  0x6f   :  { %p1293_p2 = pnand %p1292_p1, %p1286_p12 }
  0xd8   :  { %v254_v13 = vpop.permute.xlu1 %253 }
  0xd9   :  { %v220_v8 = vpop.permute.xlu0 %219 }
  0xdc   :  { %v256_v20 = vpop.permute.xlu1 %255 }
  0xdd   :  { %v222_v12 = vpop.permute.xlu0 %221 }
 0x12d   :  { %v1477_v9 = vpop.f32.mrf.mxu0 }
 0x12e   :  { %v225_v10 = vmul.f32 %v220_v8, %v1477_v9  ;;  %v259_v19 = vmul.f32 %v254_v13, %v1477_v9  ;;  %v213_v25 = vmul.f32 %v211_v22, %v1477_v9 }
 0x12f   :  { %v990_v11 = vpop.f32.mrf.mxu0 }
 0x130   :  { %229 = vrot.lane.b32.xlu0 %v225_v10, %s1345_s3  ;;  %v563_v10 = vld [vmem:[#allocation5 + $0x8] sm:$0xff] }
 0x131   :  { %v1481_v14 = vpop.f32.mrf.mxu0 }
 0x132   :  { %v226_v16 = vmul.f32 %v222_v12, %v1481_v14  ;;  %v260_v21 = vmul.f32 %v256_v20, %v1481_v14  ;;  %v214_v26 = vmul.f32 %v212_v24, %v1481_v14 }
 0x133   :  { %v991_v17 = vpop.f32.mrf.mxu0 }
 0x134   :  { %241 = vrot.lane.b32.xlu0 %v237_v15, %s1354_s7  ;;  %231 = vrot.lane.b32.xlu1 %v226_v16, %s1345_s3 }
 0x138   :  { %263 = vrot.lane.b32.xlu0 %v259_v19, %s1345_s3  ;;  %243 = vrot.lane.b32.xlu1 %v238_v18, %s1354_s7 }
 0x13c   :  { %265 = vrot.lane.b32.xlu1 %v260_v21, %s1345_s3  ;;  %s1356_s3 = smov 88  }
 0x1a2   :  { %v230_v23 = vpop.permute.xlu0 %229 }
 0x1a3   :  { %v235_v29 = vadd.f32 %v230_v23, %v213_v25 }
 0x1a6   :  { %v242_v27 = vpop.permute.xlu0 %241  ;;  %v232_v28 = vpop.permute.xlu1 %231 }
 0x1a7   :  { %v236_v30 = vadd.f32 %v232_v28, %v214_v26  ;;  %v247_v35 = vmul.f32 %v242_v27, %v1477_v9 }
 0x1a9   :  { %v271_v31 = vpack.c.bf16 %v236_v30, %v235_v29  ;;  %v1527_v29 = vpack.c.bf16 %v1481_v14, %v1477_v9 }
 0x1aa   :  { %v244_v32 = vpop.permute.xlu1 %243  ;;  %v264_v34 = vpop.permute.xlu0 %263 }
 0x1ab   :  { %564 = vrot.lane.b32.xlu1 %v271_v31, %s1355_s27  ;;  %v276_v33 = vrot.slane %v271_v31, 4  ;;  %v248_v36 = vmul.f32 %v244_v32, %v1481_v14  ;;  %v269_v38 = vadd.f32 %v264_v34, %v247_v35 }
 0x1ad   :  { %277 = vrot.lane.b32.xlu0 %v276_v33, %s1355_s27 }
 0x1ae   :  { %v266_v37 = vpop.permute.xlu1 %265 }
 0x1af   :  { %v270_v39 = vadd.f32 %v266_v37, %v248_v36 }
 0x1b1   :  { %v272_v40 = vpack.c.bf16 %v270_v39, %v269_v38 }
 0x1b3   :  { %409 = vrot.lane.b32.xlu1 %v272_v40, %s1356_s3  ;;  %284 = vrot.lane.b32.xlu0 %v272_v40, %s1353_s6  ;;  %v569_v41 = vrot.slane %v272_v40, 4 }
 0x1b7   :  { %570 = vrot.lane.b32.xlu1 %v569_v41, %s1353_s6 }
 0x21d   :  { %v565_v42 = vpop.permute.xlu1 %564 }
 0x21e   :  { %v568_v43 = vsel %vm279_vm2, %v276_v33, %v565_v42 }
 0x21f   :  { %v278_v44 = vpop.permute.xlu0 %277  ;;  %692 = vrot.lane.b32.xlu1 %v568_v43, %s1357_s28 }
 0x220   :  { %v282_v45 = vsel %vm279_vm2, %v271_v31, %v278_v44 }
 0x221   :  { %407 = vrot.lane.b32.xlu0 %v282_v45, %s1357_s28 }
 0x225   :  { %694 = vrot.lane.b32.xlu0 %v569_v41, %s1356_s3  ;;  %v285_v46 = vpop.permute.xlu0 %284  ;;  %v410_v48 = vpop.permute.xlu1 %409 }
 0x226   :  { %v290_v47 = vsel %vm286_vm3, %v285_v46, 0  ;;  %v415_v49 = vsel %vm286_vm3, %v410_v48, 0 }
 0x227   :  { %993 = vmatpush3.bf16.xpose.msra.mxu1 %v290_v47 }
 0x228   :  { %1004 = vmatprep.subr.bf16.mxu1 %v1351_v0 }
 0x229   :  { %v571_v50 = vpop.permute.xlu1 %570 }
 0x22a   :  { %v575_v52 = vsel %vm286_vm3, %v571_v50, 0 }
 0x22e   :  { %995 = vmatmul.mubr.msk.bf16.vlgmr.msra.gmra.mxu1 %vm286_vm3, %v282_v45 }
 0x22f   :  { %1005 = vmatpush3.bf16.xpose.msra.mxu1 %v415_v49  ;;  %1006 = vmatprep.mubr.msk.bf16.mxu1 %vm1352_vm0, %v1351_v0 }
 0x230   :  { %1016 = vmatprep.subr.bf16.mxu1 %v1351_v0 }
 0x291   :  { %v693_v55 = vpop.permute.xlu1 %692 }
 0x293   :  { %v408_v51 = vpop.permute.xlu0 %407 }
 0x294   :  { %1007 = vmatmul.mubr.msk.bf16.vlgmr.msra.gmra.mxu1 %vm286_vm3, %v408_v51 }
 0x295   :  { %1017 = vmatpush3.bf16.xpose.msra.mxu1 %v575_v52  ;;  %1018 = vmatprep.mubr.msk.bf16.mxu1 %vm1352_vm0, %v1351_v0 }
 0x296   :  { %1028 = vmatprep.subr.bf16.mxu1 %v1351_v0 }
 0x297   :  { %v695_v53 = vpop.permute.xlu0 %694 }
 0x298   :  { %v700_v54 = vsel %vm286_vm3, %v695_v53, 0 }
 0x29c   :  { %1019 = vmatmul.mubr.msk.bf16.vlgmr.msra.gmra.mxu1 %vm286_vm3, %v568_v43 }
 0x29d   :  { %1029 = vmatpush3.bf16.xpose.msra.mxu1 %v700_v54  ;;  %1030 = vmatprep.mubr.msk.bf16.mxu1 %vm1352_vm0, %v1351_v0 }
 0x29e   :  { %1040 = vmatprep.subr.bf16.mxu1 %v1351_v0 }
 0x2a4   :  { %1031 = vmatmul.mubr.msk.bf16.vlgmr.msra.gmra.mxu1 %vm286_vm3, %v693_v55 }
 0x2a5   :  { %1044 = vmatprep.mubr.msk.bf16.mxu1 %vm1352_vm0, %v1351_v0 }
 0x2ee   :  { %v326_v57 = vpop.f32.mrf.mxu1 }
 0x2ef   :  { %v327_v58 = vadd.f32 %v326_v57, %v274_v56 }
 0x2f0   :  { %v996_v59 = vpop.f32.mrf.mxu1 }
 0x2f1   :  { %v333_v60 = vsel %vm286_vm3, %v327_v58, -inf }
 0x2f2   :  { %334 = vmax.xlane.f32.xlu0 %v333_v60  ;;  %v329_v61 = vpop.f32.mrf.mxu1 }
 0x2f3   :  { %v330_v62 = vadd.f32 %v329_v61, %v274_v56 }
 0x2f4   :  { %v997_v63 = vpop.f32.mrf.mxu1 }
 0x2f5   :  { %v336_v1 = vsel %vm286_vm3, %v330_v62, -inf }
 0x2f6   :  { %337 = vmax.xlane.f32.xlu1 %v336_v1 }
 0x354   :  { %v451_v2 = vpop.f32.mrf.mxu1 }
 0x355   :  { %v452_v3 = vadd.f32 %v451_v2, %v274_v56 }
 0x356   :  { %v1008_v4 = vpop.f32.mrf.mxu1 }
 0x357   :  { %v458_v5 = vsel %vm286_vm3, %v452_v3, -inf }
 0x358   :  { %459 = vmax.xlane.f32.xlu0 %v458_v5  ;;  %v454_v6 = vpop.f32.mrf.mxu1 }
 0x359   :  { %v455_v7 = vadd.f32 %v454_v6, %v274_v56 }
 0x35a   :  { %v1009_v8 = vpop.f32.mrf.mxu1 }
 0x35b   :  { %v461_v11 = vsel %vm286_vm3, %v455_v7, -inf }
 0x35c   :  { %462 = vmax.xlane.f32.xlu0 %v461_v11  ;;  %v611_v12 = vpop.f32.mrf.mxu1 }
 0x35d   :  { %v612_v13 = vadd.f32 %v611_v12, %v563_v10 }
 0x35e   :  { %v1020_v15 = vpop.f32.mrf.mxu1 }
 0x35f   :  { %v618_v16 = vsel %vm286_vm3, %v612_v13, -inf }
 0x360   :  { %619 = vmax.xlane.f32.xlu1 %v618_v16  ;;  %v614_v17 = vpop.f32.mrf.mxu1 }
 0x361   :  { %v615_v18 = vadd.f32 %v614_v17, %v563_v10 }
 0x362   :  { %v1021_v19 = vpop.f32.mrf.mxu1 }
 0x363   :  { %v621_v20 = vsel %vm286_vm3, %v615_v18, -inf }
 0x364   :  { %622 = vmax.xlane.f32.xlu0 %v621_v20  ;;  %v736_v21 = vpop.f32.mrf.mxu1 }
 0x365   :  { %v737_v22 = vadd.f32 %v736_v21, %v563_v10 }
 0x366   :  { %v1032_v23 = vpop.f32.mrf.mxu1 }
 0x367   :  { %v743_v24 = vsel %vm286_vm3, %v737_v22, -inf }
 0x368   :  { %744 = vmax.xlane.f32.xlu1 %v743_v24  ;;  %v739_v25 = vpop.f32.mrf.mxu1 }
 0x369   :  { %v740_v26 = vadd.f32 %v739_v25, %v563_v10 }
 0x36a   :  { %v1033_v27 = vpop.f32.mrf.mxu1 }
 0x36b   :  { %v746_v28 = vsel %vm286_vm3, %v740_v26, -inf }
 0x36c   :  { %747 = vmax.xlane.f32.xlu0 %v746_v28 }
 0x379   :  { %357 = vrot.lane.b32.xlu1 %v1527_v29, %s1358_s29 }
 0x37b   :  { %v335_v32 = vpop.xlane.xlu0 %334 }
 0x37c   :  { %v339_v34 = vsub.f32 %v327_v58, %v335_v32 }
 0x37e   :  { %v341_v35 = vmul.f32 1.442695, %v339_v34 }
 0x37f   :  { %v338_v30 = vpop.xlane.xlu1 %337 }
 0x380   :  { %v340_v31 = vsub.f32 %v330_v62, %v338_v30 }
 0x382   :  { %v343_v33 = vmul.f32 1.442695, %v340_v31 }
 0x384   :  { %1093 = vpow2.f32 %v343_v33 }
 0x385   :  { %1095 = vpow2.f32 %v341_v35 }
 0x391   :  { %v1531_v36 = vpop.eup %1093 }
 0x392   :  { %v348_v37 = vsel %vm286_vm3, %v1531_v36, 0.0  ;;  %v1096_v9 = vpop.eup %1095 }
 0x393   :  { %349 = vadd.xlane.f32.xlu0 %v348_v37  ;;  %v345_v14 = vsel %vm286_vm3, %v1096_v9, 0.0 }
 0x39d   :  { %346 = vadd.xlane.f32.xlu1 %v345_v14 }
 0x3e1   :  { %v460_v38 = vpop.xlane.xlu0 %459 }
 0x3e2   :  { %v464_v39 = vsub.f32 %v452_v3, %v460_v38 }
 0x3e4   :  { %v466_v40 = vmul.f32 1.442695, %v464_v39 }
 0x3e5   :  { %v463_v41 = vpop.xlane.xlu0 %462 }
 0x3e6   :  { %1097 = vpow2.f32 %v466_v40  ;;  %v465_v42 = vsub.f32 %v455_v7, %v463_v41  ;;  %v641_v7 = vrot.slane %v1527_v29, 4 }
 0x3e8   :  { %v468_v43 = vmul.f32 1.442695, %v465_v42 }
 0x3e9   :  { %v620_v44 = vpop.xlane.xlu1 %619 }
 0x3ea   :  { %1099 = vpow2.f32 %v468_v43  ;;  %v624_v45 = vsub.f32 %v612_v13, %v620_v44 }
 0x3ec   :  { %v626_v46 = vmul.f32 1.442695, %v624_v45 }
 0x3ed   :  { %v623_v47 = vpop.xlane.xlu0 %622 }
 0x3ee   :  { %1101 = vpow2.f32 %v626_v46  ;;  %v625_v48 = vsub.f32 %v615_v18, %v623_v47 }
 0x3f0   :  { %v628_v49 = vmul.f32 1.442695, %v625_v48 }
 0x3f1   :  { %v745_v50 = vpop.xlane.xlu1 %744 }
 0x3f2   :  { %1103 = vpow2.f32 %v628_v49  ;;  %v749_v51 = vsub.f32 %v737_v22, %v745_v50  ;;  %v1091_v50 = vld [vmem:[#allocation14 + $0x8] sm:$0xff]  }
 0x3f3   :  { %v1098_v52 = vpop.eup %1097  ;;  %1041 = vmatpush3.bf16.msra.mxu1 %v1091_v50 }
 0x3f4   :  { %v751_v53 = vmul.f32 1.442695, %v749_v51  ;;  %v470_v54 = vsel %vm286_vm3, %v1098_v52, 0.0  ;;  %1042 = vmatprep.subr.bf16.mxu1 %v1351_v0 }
 0x3f5   :  { %471 = vadd.xlane.f32.xlu1 %v470_v54  ;;  %v358_v55 = vpop.permute.xlu1 %357  ;;  %v748_v56 = vpop.xlane.xlu0 %747 }
 0x3f6   :  { %1105 = vpow2.f32 %v751_v53  ;;  %v363_v57 = vsel %vm279_vm2, %v358_v55, 0  ;;  %v750_v58 = vsub.f32 %v740_v26, %v748_v56  ;;  %v1092_v53 = vld [vmem:[#allocation14] sm:$0xff]  }
 0x3f7   :  { %v1100_v59 = vpop.eup %1099  ;;  %999 = vmatpush3.bf16.msra.mxu0 %v363_v57  ;;  %1043 = vmatpush3.bf16.msra.mxu1 %v1092_v53 }
 0x3f8   :  { %v753_v60 = vmul.f32 1.442695, %v750_v58  ;;  %v473_v61 = vsel %vm286_vm3, %v1100_v59, 0.0  ;;  %1010 = vmatprep.subr.bf16.mxu0 %v1351_v0 }
 0x3f9   :  { %474 = vadd.xlane.f32.xlu0 %v473_v61 }
 0x3fa   :  { %1107 = vpow2.f32 %v753_v60 }
 0x3fb   :  { %v1102_v62 = vpop.eup %1101 }
 0x3fc   :  { %v630_v63 = vsel %vm286_vm3, %v1102_v62, 0.0 }
 0x3fd   :  { %631 = vadd.xlane.f32.xlu1 %v630_v63 }
 0x3ff   :  { %v1104_v1 = vpop.eup %1103 }
 0x400   :  { %v633_v2 = vsel %vm286_vm3, %v1104_v1, 0.0 }
 0x401   :  { %634 = vadd.xlane.f32.xlu0 %v633_v2 }
 0x403   :  { %v1106_v3 = vpop.eup %1105 }
 0x404   :  { %v755_v4 = vsel %vm286_vm3, %v1106_v3, 0.0 }
 0x405   :  { %756 = vadd.xlane.f32.xlu1 %v755_v4 }
 0x407   :  { %v1108_v5 = vpop.eup %1107 }
 0x408   :  { %v758_v6 = vsel %vm286_vm3, %v1108_v5, 0.0 }
 0x409   :  { %759 = vadd.xlane.f32.xlu0 %v758_v6 }
 0x416   :  { %642 = vrot.lane.b32.xlu1 %v641_v7, %s1358_s29 }
 0x41a   :  { %766 = vrot.lane.b32.xlu1 %v641_v7, %s1359_s30 }
 0x41c   :  { %v350_v8 = vpop.xlane.xlu0 %349 }
 0x41d   :  { %1109 = vrcp.f32 %v350_v8 }
 0x41f   :  { %481 = vrot.lane.b32.xlu0 %v1527_v29, %s1359_s30 }
 0x426   :  { %v347_v10 = vpop.xlane.xlu1 %346 }
 0x427   :  { %1111 = vrcp.f32 %v347_v10 }
 0x42a   :  { %v1110_v11 = vpop.eup %1109 }
 0x42b   :  { %v1550_v15 = vmul.f32 %v1110_v11, %v1531_v36 }
 0x434   :  { %v1112_v12 = vpop.eup %1111 }
 0x435   :  { %v1547_v13 = vmul.f32 %v1112_v12, %v1096_v9 }
 0x437   :  { %v355_v16 = vpack.c.bf16 %v1550_v15, %v1547_v13 }
 0x439   :  { %1001 = vmatmul.mubr.msk.bf16.vlgmr.msra.gmra.mxu0 %vm286_vm3, %v355_v16 }
 0x43a   :  { %1012 = vmatprep.mubr.msk.bf16.mxu0 %vm1352_vm0, %v1351_v0 }
 0x47e   :  { %v472_v18 = vpop.xlane.xlu1 %471 }
 0x482   :  { %v475_v17 = vpop.xlane.xlu0 %474 }
 0x483   :  { %1113 = vrcp.f32 %v475_v17 }
 0x484   :  { %1115 = vrcp.f32 %v472_v18 }
 0x486   :  { %v632_v20 = vpop.xlane.xlu1 %631 }
 0x48a   :  { %v635_v19 = vpop.xlane.xlu0 %634 }
 0x48b   :  { %1117 = vrcp.f32 %v635_v19 }
 0x48c   :  { %1119 = vrcp.f32 %v632_v20 }
 0x48e   :  { %v757_v22 = vpop.xlane.xlu1 %756 }
 0x490   :  { %v1114_v21 = vpop.eup %1113 }
 0x491   :  { %v1116_v24 = vpop.eup %1115  ;;  %v479_v25 = vmul.f32 %v1114_v21, %v1100_v59 }
 0x492   :  { %v760_v23 = vpop.xlane.xlu0 %759  ;;  %v478_v28 = vmul.f32 %v1116_v24, %v1098_v52  ;;  %v643_v29 = vpop.permute.xlu1 %642 }
 0x493   :  { %1121 = vrcp.f32 %v760_v23  ;;  %v648_v32 = vsel %vm279_vm2, %v643_v29, 0 }
 0x494   :  { %1123 = vrcp.f32 %v757_v22  ;;  %v480_v30 = vpack.c.bf16 %v479_v25, %v478_v28 }
 0x496   :  { %v482_v26 = vpop.permute.xlu0 %481  ;;  %v767_v36 = vpop.permute.xlu1 %766 }
 0x497   :  { %v487_v27 = vsel %vm279_vm2, %v482_v26, 0  ;;  %v772_v14 = vsel %vm279_vm2, %v767_v36, 0 }
 0x498   :  { %1011 = vmatpush3.bf16.msra.mxu0 %v487_v27  ;;  %v1118_v31 = vpop.eup %1117 }
 0x499   :  { %1022 = vmatprep.subr.bf16.mxu0 %v1351_v0  ;;  %v1120_v33 = vpop.eup %1119  ;;  %v639_v34 = vmul.f32 %v1118_v31, %v1104_v1 }
 0x49a   :  { %v1564_v35 = vmul.f32 %v1120_v33, %v1102_v62 }
 0x49b   :  { %1013 = vmatmul.mubr.msk.bf16.vlgmr.msra.gmra.mxu0 %vm286_vm3, %v480_v30 }
 0x49c   :  { %1023 = vmatpush3.bf16.msra.mxu0 %v648_v32  ;;  %1024 = vmatprep.mubr.msk.bf16.mxu0 %vm1352_vm0, %v1351_v0  ;;  %v640_v37 = vpack.c.bf16 %v639_v34, %v1564_v35 }
 0x49d   :  { %1034 = vmatprep.subr.bf16.mxu0 %v1351_v0 }
 0x4a0   :  { %v1122_v9 = vpop.eup %1121 }
 0x4a1   :  { %v1124_v38 = vpop.eup %1123  ;;  %v764_v39 = vmul.f32 %v1122_v9, %v1108_v5 }
 0x4a2   :  { %v763_v40 = vmul.f32 %v1124_v38, %v1106_v3 }
 0x4a3   :  { %1025 = vmatmul.mubr.msk.bf16.vlgmr.msra.gmra.mxu0 %vm286_vm3, %v640_v37 }
 0x4a4   :  { %1035 = vmatpush3.bf16.msra.mxu0 %v772_v14  ;;  %1036 = vmatprep.mubr.msk.bf16.mxu0 %vm1352_vm0, %v1351_v0  ;;  %v765_v41 = vpack.c.bf16 %v764_v39, %v763_v40 }
 0x4ab   :  { %1037 = vmatmul.mubr.msk.bf16.vlgmr.msra.gmra.mxu0 %vm286_vm3, %v765_v41 }
 0x4f9   :  { %v399_v42 = vpop.f32.mrf.mxu0 }
 0x4fb   :  { %v1002_v43 = vpop.f32.mrf.mxu0 }
 0x4fd   :  { %v402_v44 = vpop.f32.mrf.mxu0 }
 0x4ff   :  { %v1003_v45 = vpop.f32.mrf.mxu0 }
 0x55b   :  { %v523_v46 = vpop.f32.mrf.mxu0 }
 0x55d   :  { %v1014_v47 = vpop.f32.mrf.mxu0 }
 0x55f   :  { %v526_v48 = vpop.f32.mrf.mxu0 }
 0x561   :  { %v1015_v49 = vpop.f32.mrf.mxu0 }
 0x563   :  { %v684_v51 = vpop.f32.mrf.mxu0 }
 0x565   :  { %v1026_v52 = vpop.f32.mrf.mxu0 }
 0x567   :  { %v687_v54 = vpop.f32.mrf.mxu0 }
 0x568   :  { %v1073_v55 = vpack.i.bf16 %v687_v54, %v402_v44 }
 0x569   :  { %v1027_v56 = vpop.f32.mrf.mxu0 }
 0x56a   :  { %1074 = vrot.lane.b32.xlu0 %v1073_v55, %s1341_s13 }
 0x56b   :  { %v808_v57 = vpop.f32.mrf.mxu0 }
 0x56c   :  { %v1078_v58 = vpack.i.bf16 %v808_v57, %v523_v46 }
 0x56d   :  { %v1038_v59 = vpop.f32.mrf.mxu0 }
 0x56e   :  { %1079 = vrot.lane.b32.xlu1 %v1078_v58, %s1360_s5 }
 0x56f   :  { %v811_v60 = vpop.f32.mrf.mxu0 }
 0x570   :  { %v1083_v61 = vpack.i.bf16 %v811_v60, %v526_v48 }
 0x571   :  { %v1039_v62 = vpop.f32.mrf.mxu0 }
 0x572   :  { %531 = vrot.lane.b32.xlu1 %v1550_v15, %s1341_s13  ;;  %1084 = vrot.lane.b32.xlu0 %v1083_v61, %s1361_s10 }
 0x576   :  { %539 = vrot.lane.b32.xlu1 %v479_v25, %s1361_s10  ;;  %535 = vrot.lane.b32.xlu0 %v478_v28, %s1360_s5 }
 0x57a   :  { %820 = vrot.lane.b32.xlu1 %v763_v40, %s1360_s5  ;;  %816 = vrot.lane.b32.xlu0 %v639_v34, %s1341_s13 }
 0x57e   :  { %824 = vrot.lane.b32.xlu0 %v764_v39, %s1361_s10 }
 0x5dc   :  { %v1075_v0 = vpop.permute.xlu0 %1074 }
 0x5dd   :  { %v1077_v1 = vunpack.i.h.bf16 %v1075_v0  ;;  %v1076_v2 = vunpack.i.l.bf16 %v1075_v0 }
 0x5df   :  { %v842_v7 = vsel %vm286_vm3, %v684_v51, %v1077_v1  ;;  %v559_v8 = vsel %vm286_vm3, %v399_v42, %v1076_v2 }
 0x5e0   :  { %v1080_v63 = vpop.permute.xlu1 %1079 }
 0x5e1   :  { %v1082_v3 = vunpack.i.h.bf16 %v1080_v63  ;;  %v1081_v4 = vunpack.i.l.bf16 %v1080_v63 }
 0x5e3   :  { %v560_v12 = vsel %vm543_vm4, %v559_v8, %v1081_v4  ;;  %v843_v15 = vsel %vm543_vm4, %v842_v7, %v1082_v3 }
 0x5e4   :  { %v532_v5 = vpop.permute.xlu1 %531  ;;  %v1085_v6 = vpop.permute.xlu0 %1084 }
 0x5e5   :  { %v1087_v10 = vunpack.i.h.bf16 %v1085_v6  ;;  %v1086_v11 = vunpack.i.l.bf16 %v1085_v6  ;;  %v542_v18 = vsel %vm286_vm3, %v1547_v13, %v532_v5 }
 0x5e7   :  { %v561_v16 = vsel %vm545_vm5, %v560_v12, %v1086_v11  ;;  %v844_v17 = vsel %vm545_vm5, %v843_v15, %v1087_v10 }
 0x5e8   :  { %v540_v19 = vpop.permute.xlu1 %539  ;;  %v536_v20 = vpop.permute.xlu0 %535  ;;  %v847_v21 = vpack.c.bf16 %v844_v17, %v561_v16 }
 0x5e9   :  { %v544_v22 = vsel %vm543_vm4, %v542_v18, %v536_v20 }
 0x5ea   :  { %v546_v23 = vsel %vm545_vm5, %v544_v22, %v540_v19  ;;  %1045 = vmatmul.mubr.msk.bf16.vlgmr.msra.gmra.mxu1 %vm166_vm1, %v847_v21 }
 0x5eb   :  { %845 = vst.msk [vmem:[#allocation17] sm:$0xff] %vm166_vm1, %v546_v23 }
 0x5ec   :  { %v817_v24 = vpop.permute.xlu0 %816  ;;  %v821_v25 = vpop.permute.xlu1 %820 }
 0x5ed   :  { %v827_v26 = vsel %vm286_vm3, %v1564_v35, %v817_v24 }
 0x5ee   :  { %v828_v27 = vsel %vm543_vm4, %v827_v26, %v821_v25 }
 0x5f0   :  { %v825_v28 = vpop.permute.xlu0 %824 }
 0x5f1   :  { %v829_v13 = vsel %vm545_vm5, %v828_v27, %v825_v28 }
 0x5f2   :  { %846 = vst.msk [vmem:[#allocation17 + $0x8] sm:$0xff] %vm166_vm1, %v829_v13 }
 0x5f3   :  { %1296 = shalt.err (!%p1293_p2)
}
 0x5f4   :  { %933 = dma.vmem_to_hbm [thread:$0]  %s928_s14, 256, %s1617_s9, [#allocation18], %s1340_s12, %s1340_s12, %s1341_s13  }
 0x5f5   :  { %s1363_s0 = smov [#allocation16]  }
 0x5f6   :  { %s915_s18 = sshll.u32 %s1363_s0, 4  ;;  %s916_s18 = int_to_ptr.vmem [resolvable:$true] %s915_s18 }
 0x5f7   :  { %s1305_s19 = scalar_lea.vmem %s916_s18, 256  ;;  %p1310_p4 = scmp.lt.s32.totalorder %s916_s18, %s916_s18 }
 0x5f8   :  { %p1306_p3 = scmp.ne.s32.totalorder %s916_s18, %s1305_s19  ;;  %p1311_p5 = scmp.lt.s32.totalorder %s1305_s19, %s1305_s19 }
 0x5fa   :  { %p1312_p6 = por %p1311_p5, %p1310_p4 }
 0x5fc   :  { %p1313_p7 = pnand %p1312_p6, %p1306_p3 }
 0x6aa   :  { %v901_v29 = vpop.f32.mrf.mxu1 }
 0x6ab   :  { %908 = vst.msk [vmem:[#allocation16] sm:$0xff] %vm166_vm1, %v901_v29 }
 0x6ac   :  { %v1046_v30 = vpop.f32.mrf.mxu1 }
 0x6ae   :  { %v904_v31 = vpop.f32.mrf.mxu1 }
 0x6af   :  { %909 = vst.msk [vmem:[#allocation16 + $0x8] sm:$0xff] %vm166_vm1, %v904_v31 }
 0x6b0   :  { %v1047_v32 = vpop.f32.mrf.mxu1 }
 0x6b1   :  { %1316 = shalt.err (!%p1313_p7)
}
 0x6b2   :  { %921 = dma.vmem_to_hbm [thread:$0]  %s916_s18, 256, %s1616_s8, [#allocation4], %s1340_s12, %s1340_s12, %s1341_s13  }
 0x6b3   :  { %1335 = dma.done.wait [#allocation4], 256  }
 0x6b4   :  { %1336 = vsyncadd [#allocation4], 4294967040 }
 0x6b5   :  { %1337 = dma.done.wait [#allocation18], 256  }
 0x6b6   :  { %1338 = vsyncadd [#allocation18], 4294967040 }
 0x6b7   :  { %940 = vsyncpa [#allocation3], 1 }
 0x6b8   :  { %941 = vsyncpa [#allocation6], 1 }
 0x6b9   :  { %942 = vsyncpa [#allocation9], 1 }
 0x6ba   :  { %943 = vsyncpa [#allocation12], 1 }
 0x6bb   :  { %944 = vsyncpa [#allocation15], 1 }
 0x6bc   :  { %945 = vsyncpa [#allocation4], 1 }
 0x6bd   :  { %946 = vsyncpa [#allocation18], 1 }

</bundles_post_ra>
